<compile_context>
chip_gen: v5e
topology: v5e:2x2
jax: 0.10.0
libtpu: 0.0.40
codegen_flags: <defaults>
</compile_context>

<pallas_src>
import jax
import jax.numpy as jnp
from jax import lax
from jax.experimental import pallas as pl
from jax.experimental.pallas import tpu as pltpu


def _round_up(x, m):
    return ((x + m - 1) // m) * m


def _cdiv(a, b):
    return -(-a // b)


def _tpu_generation():
    """Return (vmem_budget_bytes, is_v7x); conservative fallback if unknown."""
    kind = ""
    try:
        kind = jax.devices()[0].device_kind.lower()
    except Exception:
        pass
    is_v7 = ("v7" in kind) or ("7x" in kind)
    # Physical VMEM: 64 MiB per TensorCore on v7x, 128 MiB on v5e/v6e.
    # Leave headroom for Mosaic-internal scratch / semaphores.
    cap = (48 if is_v7 else 100) * 1024 * 1024
    return cap, is_v7


def _make_kernel(num, n_real_out, n_pad_out, compute_dtype):
    """Fused cat -> linear -> ReLU -> (dropout) -> linear -> softmax."""

    def kernel(*refs):
        x_refs = refs[:num]
        w1_ref, b1_ref, w2_ref, b2_ref, o_ref = refs[num:]

        # --- torch.cat + fusion_linear -----------------------------------
        # One lane-axis concat of the `num` segments feeding ONE K=F matmul.
        # (Per-segment W1 column slices would be lane-unaligned masked loads
        # of the resident W1 block plus (num-1) extra [bm, H] adds per step.)
        xcat = jnp.concatenate(
            [r[...].astype(compute_dtype) for r in x_refs], axis=-1)
        # dot_general contracts the LAST axis of both operands, so the torch
        # [hidden, F] weight layout is consumed without a wrapper-side HBM
        # transpose.  (If the lowered bundle ever shows a per-step vxpose
        # here, pre-transpose the weights once in the wrapper instead.)
        h = lax.dot_general(
            xcat, w1_ref[...],
            dimension_numbers=(((1,), (1,)), ((), ())),
            preferred_element_type=jnp.float32)
        h = jnp.maximum(h + b1_ref[...], 0.0)            # bias + ReLU in f32
        # TODO(synk): dropout_rate=0 is an identity; a nonzero rate would need
        # pltpu.prng_seed / pltpu.prng_random_bits masking here.

        # --- output_linear + numerically-stable softmax ------------------
        logits = lax.dot_general(
            h.astype(compute_dtype), w2_ref[...],
            dimension_numbers=(((1,), (1,)), ((), ())),
            preferred_element_type=jnp.float32) + b2_ref[...]

        if n_pad_out > n_real_out:
            # Padded output lanes have zero weights/bias (logit == 0): mask
            # them out of the row max and zero their exp() so they contribute
            # nothing to the denominator.  Never feed huge-magnitude
            # sentinels (e.g. -1e30) into exp() on hardware.
            col = lax.broadcasted_iota(jnp.int32, logits.shape, 1)
            valid = col < n_real_out
            m = jnp.max(jnp.where(valid, logits, jnp.finfo(jnp.float32).min),
                        axis=-1, keepdims=True)
            e = jnp.where(valid, jnp.exp(logits - m), 0.0)
        else:
            m = jnp.max(logits, axis=-1, keepdims=True)
            e = jnp.exp(logits - m)

        denom = jnp.sum(e, axis=-1, keepdims=True)
        # Exact division ([bm, 1] denominator -> negligible work) so rows sum
        # to 1 within f32 rounding.
        o_ref[...] = (e / denom).astype(o_ref.dtype)

    return kernel


def nnfusion_forward(x_list, w1, b1, w2, b2, *, compute_dtype=jnp.bfloat16):
    """
    x_list: list of `num` arrays, each [B, input_size]
    w1: [hidden, input_size*num], b1: [hidden]   (torch nn.Linear layout)
    w2: [output_size, hidden],    b2: [output_size]
    returns: [B, output_size] softmax probabilities (float32)
    """
    num = len(x_list)
    B, input_size = x_list[0].shape
    H, F = w1.shape
    O = w2.shape[0]
    assert F == input_size * num

    # ---- lane-dense output: pad O to a multiple of 128 with zero rows ----
    OP = _round_up(O, 128)
    w2_p = jnp.pad(w2, ((0, OP - O), (0, 0))) if OP != O else w2
    b2_p = jnp.pad(b2, (0, OP - O)) if OP != O else b2

    # One-time parameter prep: bf16 weights run the MXU at its quoted peak and
    # halve VMEM residency / HBM bytes; biases stay f32 (all post-matmul math
    # is done in f32 inside the kernel).
    w1_c = w1.astype(compute_dtype)
    w2_c = w2_p.astype(compute_dtype)
    b1_2d = b1.astype(jnp.float32).reshape(1, H)
    b2_2d = b2_p.astype(jnp.float32).reshape(1, OP)

    # ---- batch tile derived from a VMEM budget (not a hard-coded 128) ----
    vmem_cap, is_v7 = _tpu_generation()
    w_bytes = jnp.dtype(compute_dtype).itemsize
    x_bytes = jnp.dtype(x_list[0].dtype).itemsize
    # Resident weights/biases (count 2 buffers in case single-buffering via
    # pipeline_mode is unavailable and Pallas double-buffers them anyway).
    resident = 2 * ((H * F + OP * H) * w_bytes + (H + OP) * 4)
    # Per batch row: double-buffered x segments + double-buffered f32 output
    # + in-kernel f32 temporaries (h, logits, exp/mask).
    per_row = 2 * F * x_bytes + 2 * OP * 4 + (2 * H + 3 * OP) * 4
    avail = int(0.75 * vmem_cap) - resident
    # TODO(synk): if `avail <= 0` (weights alone exceed the VMEM budget, e.g.
    # very large hidden dims on v7x's 64 MiB), add a hidden-dim grid axis with
    # an f32 VMEM accumulator (pl.when init/finalize) instead of keeping the
    # whole weights resident.
    bm = max(8, min(1024, avail // per_row)) if avail > 0 else 8
    bm = (bm // 8) * 8
    b_ceil = _round_up(B, 8)
    bm = min(bm, b_ceil)
    if is_v7 and b_ceil >= 16:
        # 2 TensorCores per chip: keep >=2 parallel batch tiles when possible.
        bm = min(bm, _round_up(_cdiv(b_ceil, 2), 8))
    bm = max(8, (bm // 8) * 8)

    Bp = _round_up(B, bm)
    nb = Bp // bm
    x_pad = [jnp.pad(x, ((0, Bp - B), (0, 0))) if Bp != B else x for x in x_list]

    # vmem_limit from the actual block footprint (+ headroom), capped per
    # generation.
    used = resident + bm * per_row
    vmem_limit = int(min(vmem_cap, max(2 * used, 32 * 1024 * 1024)))

    kernel = _make_kernel(num, O, OP, compute_dtype)

    def _build_specs(single_buffer_weights):
        if single_buffer_weights:
            def w_spec(shape):
                # Constant index_map -> block never changes; 1 buffer is enough.
                return pl.BlockSpec(shape, lambda i: (0, 0),
                                    pipeline_mode=pl.Buffered(1))
        else:
            def w_spec(shape):
                return pl.BlockSpec(shape, lambda i: (0, 0))
        in_specs = (
            [pl.BlockSpec((bm, input_size), lambda i: (i, 0)) for _ in range(num)]
            + [w_spec((H, F)), w_spec((1, H)), w_spec((OP, H)), w_spec((1, OP))]
        )
        out_spec = pl.BlockSpec((bm, OP), lambda i: (i, 0))
        return in_specs, out_spec

    def _run(single_buffer_weights):
        in_specs, out_spec = _build_specs(single_buffer_weights)
        return pl.pallas_call(
            kernel,
            out_shape=jax.ShapeDtypeStruct((Bp, OP), jnp.float32),
            grid=(nb,),
            in_specs=in_specs,
            out_specs=out_spec,
            compiler_params=pltpu.CompilerParams(
                dimension_semantics=("parallel",),  # batch tiles across TCs (v7x)
                vmem_limit_bytes=vmem_limit,
            ),
        )(*x_pad, w1_c, b1_2d, w2_c, b2_2d)

    try:
        out = _run(True)
    except Exception:
        # pipeline_mode=pl.Buffered(1) not supported by this jax version /
        # execution mode: fall back to default (double-buffered) weight blocks.
        out = _run(False)

    # Drop batch padding and output-lane padding.
    return out[:B, :O]


if __name__ == "__main__":
    # Module config: input_size=16, num=2, hidden_size=32, output_size=8, batch=2
    input_size, num, hidden_size, output_size, batch = 16, 2, 32, 8, 2

    key = jax.random.PRNGKey(0)
    k_x1, k_x2, k_w1, k_b1, k_w2, k_b2 = jax.random.split(key, 6)

    x_list = [
        jax.random.normal(k_x1, (batch, input_size), dtype=jnp.float32),
        jax.random.normal(k_x2, (batch, input_size), dtype=jnp.float32),
    ]
    # torch nn.Linear parameter shapes: W [out, in], b [out]
    w1 = jax.random.normal(k_w1, (hidden_size, input_size * num), jnp.float32) * 0.1
    b1 = jax.random.normal(k_b1, (hidden_size,), jnp.float32) * 0.1
    w2 = jax.random.normal(k_w2, (output_size, hidden_size), jnp.float32) * 0.1
    b2 = jax.random.normal(k_b2, (output_size,), jnp.float32) * 0.1

    # Pure-JAX reference (PyTorch semantics) in f32.
    x_cat = jnp.concatenate(x_list, axis=1)
    h_ref = jnp.maximum(x_cat @ w1.T + b1, 0.0)
    ref = jax.nn.softmax(h_ref @ w2.T + b2, axis=1)

    # f32 kernel path: matches the reference closely.
    out_f32 = jax.block_until_ready(
        nnfusion_forward(x_list, w1, b1, w2, b2, compute_dtype=jnp.float32))
    assert out_f32.shape == (batch, output_size)
    assert bool(jnp.isfinite(out_f32).all())
    assert jnp.allclose(out_f32, ref, atol=2e-3, rtol=2e-2)
    assert jnp.allclose(jnp.sum(out_f32, axis=1), 1.0, atol=1e-3)

    # Default bf16-MXU path: looser tolerance from bf16 matmul inputs.
    out_bf16 = jax.block_until_ready(nnfusion_forward(x_list, w1, b1, w2, b2))
    assert out_bf16.shape == (batch, output_size)
    assert bool(jnp.isfinite(out_bf16).all())
    assert jnp.allclose(out_bf16, ref, atol=5e-3, rtol=5e-2)
    assert jnp.allclose(jnp.sum(out_bf16, axis=1), 1.0, atol=1e-3)

    print("KERNEL_OK")
</pallas_src>

<mosaic_0001>
module attributes {stable_mosaic.version = 11 : i64} {
  func.func @kernel(%arg0: i32, %arg1: memref<8x16xf32, #tpu.memory_space<vmem>>, %arg2: memref<8x16xf32, #tpu.memory_space<vmem>>, %arg3: memref<32x32xf32, #tpu.memory_space<vmem>>, %arg4: memref<1x32xf32, #tpu.memory_space<vmem>>, %arg5: memref<128x32xf32, #tpu.memory_space<vmem>>, %arg6: memref<1x128xf32, #tpu.memory_space<vmem>>, %arg7: memref<8x128xf32, #tpu.memory_space<vmem>>) attributes {dimension_semantics = [#tpu.dimension_semantics<parallel>], iteration_bounds = array<i64: 1>, scalar_prefetch = 0 : i64, scratch_operands = 0 : i64, tpu.core_type = #tpu.core_type<tc>, window_params = [{transform_indices = @transform_0, window_bounds = array<i64: 8, 16>}, {transform_indices = @transform_1, window_bounds = array<i64: 8, 16>}, {pipeline_mode = #tpu.pipeline_mode<synchronous>, transform_indices = @transform_2, window_bounds = array<i64: 32, 32>}, {pipeline_mode = #tpu.pipeline_mode<synchronous>, transform_indices = @transform_3, window_bounds = array<i64: 1, 32>}, {pipeline_mode = #tpu.pipeline_mode<synchronous>, transform_indices = @transform_4, window_bounds = array<i64: 128, 32>}, {pipeline_mode = #tpu.pipeline_mode<synchronous>, transform_indices = @transform_5, window_bounds = array<i64: 1, 128>}, {transform_indices = @transform_6, window_bounds = array<i64: 8, 128>}]} {
    %c0 = arith.constant 0 : index
    %c0_0 = arith.constant 0 : index
    %0 = vector.load %arg1[%c0, %c0_0] : memref<8x16xf32, #tpu.memory_space<vmem>>, vector<8x16xf32>
    %c0_1 = arith.constant 0 : index
    %c0_2 = arith.constant 0 : index
    %1 = vector.load %arg2[%c0_1, %c0_2] : memref<8x16xf32, #tpu.memory_space<vmem>>, vector<8x16xf32>
    %2 = tpu.concatenate %0, %1 in 1 : vector<8x16xf32>, vector<8x16xf32> -> vector<8x32xf32>
    %c0_3 = arith.constant 0 : index
    %c0_4 = arith.constant 0 : index
    %3 = vector.load %arg3[%c0_3, %c0_4] : memref<32x32xf32, #tpu.memory_space<vmem>>, vector<32x32xf32>
    %cst = arith.constant dense<0.000000e+00> : vector<8x32xf32>
    %4 = tpu.matmul %2, %3, %cst {dimension_numbers = #tpu.dot_dimension_numbers<[1], [1], [0], [0], [0, 0, 1, 0], [], []>} : vector<8x32xf32>, vector<32x32xf32>, vector<8x32xf32> -> vector<8x32xf32>
    %c0_5 = arith.constant 0 : index
    %c0_6 = arith.constant 0 : index
    %5 = vector.load %arg4[%c0_5, %c0_6] : memref<1x32xf32, #tpu.memory_space<vmem>>, vector<1x32xf32>
    %6 = vector.broadcast %5 : vector<1x32xf32> to vector<8x32xf32>
    %7 = arith.addf %4, %6 : vector<8x32xf32>
    %cst_7 = arith.constant 0.000000e+00 : f32
    %8 = vector.broadcast %cst_7 : f32 to vector<8x32xf32>
    %9 = arith.maximumf %7, %8 : vector<8x32xf32>
    %c0_8 = arith.constant 0 : index
    %c0_9 = arith.constant 0 : index
    %10 = vector.load %arg5[%c0_8, %c0_9] : memref<128x32xf32, #tpu.memory_space<vmem>>, vector<128x32xf32>
    %cst_10 = arith.constant dense<0.000000e+00> : vector<8x128xf32>
    %11 = tpu.matmul %9, %10, %cst_10 {dimension_numbers = #tpu.dot_dimension_numbers<[1], [1], [0], [0], [0, 0, 1, 0], [], []>} : vector<8x32xf32>, vector<128x32xf32>, vector<8x128xf32> -> vector<8x128xf32>
    %c0_11 = arith.constant 0 : index
    %c0_12 = arith.constant 0 : index
    %12 = vector.load %arg6[%c0_11, %c0_12] : memref<1x128xf32, #tpu.memory_space<vmem>>, vector<1x128xf32>
    %13 = vector.broadcast %12 : vector<1x128xf32> to vector<8x128xf32>
    %14 = arith.addf %11, %13 : vector<8x128xf32>
    %15 = tpu.iota {dimensions = array<i32: 1>} : vector<8x128xi32>
    %c8_i32 = arith.constant 8 : i32
    %16 = vector.broadcast %c8_i32 : i32 to vector<8x128xi32>
    %17 = arith.cmpi slt, %15, %16 : vector<8x128xi32>
    %cst_13 = arith.constant -3.40282347E+38 : f32
    %18 = vector.broadcast %cst_13 : f32 to vector<8x128xf32>
    %19 = arith.select %17, %14, %18 : vector<8x128xi1>, vector<8x128xf32>
    %cst_14 = arith.constant dense<0xFF800000> : vector<8xf32>
    %20 = vector.multi_reduction <maximumf>, %19, %cst_14 [1] : vector<8x128xf32> to vector<8xf32>
    %21 = vector.shape_cast %20 : vector<8xf32> to vector<8x1xf32>
    %22 = vector.broadcast %21 : vector<8x1xf32> to vector<8x128xf32>
    %23 = arith.subf %14, %22 : vector<8x128xf32>
    %24 = math.exp %23 : vector<8x128xf32>
    %cst_15 = arith.constant 0.000000e+00 : f32
    %25 = vector.broadcast %cst_15 : f32 to vector<8x128xf32>
    %26 = arith.select %17, %24, %25 : vector<8x128xi1>, vector<8x128xf32>
    %cst_16 = arith.constant dense<0.000000e+00> : vector<8xf32>
    %27 = vector.multi_reduction <add>, %26, %cst_16 [1] : vector<8x128xf32> to vector<8xf32>
    %28 = vector.shape_cast %27 : vector<8xf32> to vector<8x1xf32>
    %29 = vector.broadcast %28 : vector<8x1xf32> to vector<8x128xf32>
    %30 = arith.divf %26, %29 : vector<8x128xf32>
    %c0_17 = arith.constant 0 : index
    %c0_18 = arith.constant 0 : index
    %31 = vector.load %arg7[%c0_17, %c0_18] : memref<8x128xf32, #tpu.memory_space<vmem>>, vector<8x128xf32>
    tpu.vector_store %arg7[%c0_17, %c0_18], %30 {strides = array<i32>} : memref<8x128xf32, #tpu.memory_space<vmem>>, vector<8x128xf32>,
    return
  }
  func.func @transform_0(%arg0: i32) -> (i32, i32) {
    %c0_i32 = arith.constant 0 : i32
    %c0_i32_0 = arith.constant 0 : i32
    return %arg0, %c0_i32 : i32, i32
  }
  func.func @transform_1(%arg0: i32) -> (i32, i32) {
    %c0_i32 = arith.constant 0 : i32
    %c0_i32_0 = arith.constant 0 : i32
    return %arg0, %c0_i32 : i32, i32
  }
  func.func @transform_2(%arg0: i32) -> (i32, i32) {
    %c0_i32 = arith.constant 0 : i32
    %c0_i32_0 = arith.constant 0 : i32
    %c0_i32_1 = arith.constant 0 : i32
    return %c0_i32, %c0_i32_0 : i32, i32
  }
  func.func @transform_3(%arg0: i32) -> (i32, i32) {
    %c0_i32 = arith.constant 0 : i32
    %c0_i32_0 = arith.constant 0 : i32
    %c0_i32_1 = arith.constant 0 : i32
    return %c0_i32, %c0_i32_0 : i32, i32
  }
  func.func @transform_4(%arg0: i32) -> (i32, i32) {
    %c0_i32 = arith.constant 0 : i32
    %c0_i32_0 = arith.constant 0 : i32
    %c0_i32_1 = arith.constant 0 : i32
    return %c0_i32, %c0_i32_0 : i32, i32
  }
  func.func @transform_5(%arg0: i32) -> (i32, i32) {
    %c0_i32 = arith.constant 0 : i32
    %c0_i32_0 = arith.constant 0 : i32
    %c0_i32_1 = arith.constant 0 : i32
    return %c0_i32, %c0_i32_0 : i32, i32
  }
  func.func @transform_6(%arg0: i32) -> (i32, i32) {
    %c0_i32 = arith.constant 0 : i32
    %c0_i32_0 = arith.constant 0 : i32
    return %arg0, %c0_i32 : i32, i32
  }
}

module attributes {stable_mosaic.version = 11 : i64} {
  func.func @kernel(%arg0: i32, %arg1: memref<8x16xf32, #tpu.memory_space<vmem>>, %arg2: memref<8x16xf32, #tpu.memory_space<vmem>>, %arg3: memref<32x32xf32, #tpu.memory_space<vmem>>, %arg4: memref<1x32xf32, #tpu.memory_space<vmem>>, %arg5: memref<128x32xf32, #tpu.memory_space<vmem>>, %arg6: memref<1x128xf32, #tpu.memory_space<vmem>>, %arg7: memref<8x128xf32, #tpu.memory_space<vmem>>) attributes {dimension_semantics = [#tpu.dimension_semantics<parallel>], iteration_bounds = array<i64: 1>, scalar_prefetch = 0 : i64, scratch_operands = 0 : i64, tpu.core_type = #tpu.core_type<tc>, window_params = [{transform_indices = @transform_0, window_bounds = array<i64: 8, 16>}, {transform_indices = @transform_1, window_bounds = array<i64: 8, 16>}, {pipeline_mode = #tpu.pipeline_mode<synchronous>, transform_indices = @transform_2, window_bounds = array<i64: 32, 32>}, {pipeline_mode = #tpu.pipeline_mode<synchronous>, transform_indices = @transform_3, window_bounds = array<i64: 1, 32>}, {pipeline_mode = #tpu.pipeline_mode<synchronous>, transform_indices = @transform_4, window_bounds = array<i64: 128, 32>}, {pipeline_mode = #tpu.pipeline_mode<synchronous>, transform_indices = @transform_5, window_bounds = array<i64: 1, 128>}, {transform_indices = @transform_6, window_bounds = array<i64: 8, 128>}]} {
    %c0 = arith.constant 0 : index
    %c0_0 = arith.constant 0 : index
    %0 = vector.load %arg1[%c0, %c0_0] : memref<8x16xf32, #tpu.memory_space<vmem>>, vector<8x16xf32>
    %c0_1 = arith.constant 0 : index
    %c0_2 = arith.constant 0 : index
    %1 = vector.load %arg2[%c0_1, %c0_2] : memref<8x16xf32, #tpu.memory_space<vmem>>, vector<8x16xf32>
    %2 = tpu.concatenate %0, %1 in 1 : vector<8x16xf32>, vector<8x16xf32> -> vector<8x32xf32>
    %c0_3 = arith.constant 0 : index
    %c0_4 = arith.constant 0 : index
    %3 = vector.load %arg3[%c0_3, %c0_4] : memref<32x32xf32, #tpu.memory_space<vmem>>, vector<32x32xf32>
    %cst = arith.constant dense<0.000000e+00> : vector<8x32xf32>
    %4 = tpu.matmul %2, %3, %cst {dimension_numbers = #tpu.dot_dimension_numbers<[1], [1], [0], [0], [0, 0, 1, 0], [], []>} : vector<8x32xf32>, vector<32x32xf32>, vector<8x32xf32> -> vector<8x32xf32>
    %c0_5 = arith.constant 0 : index
    %c0_6 = arith.constant 0 : index
    %5 = vector.load %arg4[%c0_5, %c0_6] : memref<1x32xf32, #tpu.memory_space<vmem>>, vector<1x32xf32>
    %6 = vector.broadcast %5 : vector<1x32xf32> to vector<8x32xf32>
    %7 = arith.addf %4, %6 : vector<8x32xf32>
    %cst_7 = arith.constant 0.000000e+00 : f32
    %8 = vector.broadcast %cst_7 : f32 to vector<8x32xf32>
    %9 = arith.maximumf %7, %8 : vector<8x32xf32>
    %c0_8 = arith.constant 0 : index
    %c0_9 = arith.constant 0 : index
    %10 = vector.load %arg5[%c0_8, %c0_9] : memref<128x32xf32, #tpu.memory_space<vmem>>, vector<128x32xf32>
    %cst_10 = arith.constant dense<0.000000e+00> : vector<8x128xf32>
    %11 = tpu.matmul %9, %10, %cst_10 {dimension_numbers = #tpu.dot_dimension_numbers<[1], [1], [0], [0], [0, 0, 1, 0], [], []>} : vector<8x32xf32>, vector<128x32xf32>, vector<8x128xf32> -> vector<8x128xf32>
    %c0_11 = arith.constant 0 : index
    %c0_12 = arith.constant 0 : index
    %12 = vector.load %arg6[%c0_11, %c0_12] : memref<1x128xf32, #tpu.memory_space<vmem>>, vector<1x128xf32>
    %13 = vector.broadcast %12 : vector<1x128xf32> to vector<8x128xf32>
    %14 = arith.addf %11, %13 : vector<8x128xf32>
    %15 = tpu.iota {dimensions = array<i32: 1>} : vector<8x128xi32>
    %c8_i32 = arith.constant 8 : i32
    %16 = vector.broadcast %c8_i32 : i32 to vector<8x128xi32>
    %17 = arith.cmpi slt, %15, %16 : vector<8x128xi32>
    %cst_13 = arith.constant -3.40282347E+38 : f32
    %18 = vector.broadcast %cst_13 : f32 to vector<8x128xf32>
    %19 = arith.select %17, %14, %18 : vector<8x128xi1>, vector<8x128xf32>
    %cst_14 = arith.constant dense<0xFF800000> : vector<8xf32>
    %20 = vector.multi_reduction <maximumf>, %19, %cst_14 [1] : vector<8x128xf32> to vector<8xf32>
    %21 = vector.shape_cast %20 : vector<8xf32> to vector<8x1xf32>
    %22 = vector.broadcast %21 : vector<8x1xf32> to vector<8x128xf32>
    %23 = arith.subf %14, %22 : vector<8x128xf32>
    %24 = math.exp %23 : vector<8x128xf32>
    %cst_15 = arith.constant 0.000000e+00 : f32
    %25 = vector.broadcast %cst_15 : f32 to vector<8x128xf32>
    %26 = arith.select %17, %24, %25 : vector<8x128xi1>, vector<8x128xf32>
    %cst_16 = arith.constant dense<0.000000e+00> : vector<8xf32>
    %27 = vector.multi_reduction <add>, %26, %cst_16 [1] : vector<8x128xf32> to vector<8xf32>
    %28 = vector.shape_cast %27 : vector<8xf32> to vector<8x1xf32>
    %29 = vector.broadcast %28 : vector<8x1xf32> to vector<8x128xf32>
    %30 = arith.divf %26, %29 : vector<8x128xf32>
    %c0_17 = arith.constant 0 : index
    %c0_18 = arith.constant 0 : index
    %31 = vector.load %arg7[%c0_17, %c0_18] : memref<8x128xf32, #tpu.memory_space<vmem>>, vector<8x128xf32>
    tpu.vector_store %arg7[%c0_17, %c0_18], %30 {strides = array<i32>} : memref<8x128xf32, #tpu.memory_space<vmem>>, vector<8x128xf32>,
    return
  }
  func.func @transform_0(%arg0: i32) -> (i32, i32) {
    %c0_i32 = arith.constant 0 : i32
    %c0_i32_0 = arith.constant 0 : i32
    return %arg0, %c0_i32 : i32, i32
  }
  func.func @transform_1(%arg0: i32) -> (i32, i32) {
    %c0_i32 = arith.constant 0 : i32
    %c0_i32_0 = arith.constant 0 : i32
    return %arg0, %c0_i32 : i32, i32
  }
  func.func @transform_2(%arg0: i32) -> (i32, i32) {
    %c0_i32 = arith.constant 0 : i32
    %c0_i32_0 = arith.constant 0 : i32
    %c0_i32_1 = arith.constant 0 : i32
    return %c0_i32, %c0_i32_0 : i32, i32
  }
  func.func @transform_3(%arg0: i32) -> (i32, i32) {
    %c0_i32 = arith.constant 0 : i32
    %c0_i32_0 = arith.constant 0 : i32
    %c0_i32_1 = arith.constant 0 : i32
    return %c0_i32, %c0_i32_0 : i32, i32
  }
  func.func @transform_4(%arg0: i32) -> (i32, i32) {
    %c0_i32 = arith.constant 0 : i32
    %c0_i32_0 = arith.constant 0 : i32
    %c0_i32_1 = arith.constant 0 : i32
    return %c0_i32, %c0_i32_0 : i32, i32
  }
  func.func @transform_5(%arg0: i32) -> (i32, i32) {
    %c0_i32 = arith.constant 0 : i32
    %c0_i32_0 = arith.constant 0 : i32
    %c0_i32_1 = arith.constant 0 : i32
    return %c0_i32, %c0_i32_0 : i32, i32
  }
  func.func @transform_6(%arg0: i32) -> (i32, i32) {
    %c0_i32 = arith.constant 0 : i32
    %c0_i32_0 = arith.constant 0 : i32
    return %arg0, %c0_i32 : i32, i32
  }
}

</mosaic_0001>

<bundles_post_ra>
// kernel: tpu_custom_call.1
= control target key start
LH: loop header
LB: loop body
LE: loop exit
PB: predicated region body
PF: predicated region fallthrough
CT: control target
= control target key end

     0   :  { %vm40_vm0 = vcmask 261120   ;;  %s268_s25 = smov 16   ;;  %s402_s0 = inlined_call_operand.vmem [shape: f32[8,16], index: 0, kind: input, shape index: {}]   ;;  %s403_s1 = inlined_call_operand.vmem [shape: f32[8,16], index: 1, kind: input, shape index: {}]   ;;  %s404_s2 = inlined_call_operand.vmem [shape: f32[32,32], index: 2, kind: input, shape index: {}]   ;;  %s405_s3 = inlined_call_operand.vmem [shape: f32[1,32], index: 3, kind: input, shape index: {}]   ;;  %s406_s4 = inlined_call_operand.vmem [shape: f32[128,32], index: 4, kind: input, shape index: {}]   ;;  %s407_s5 = inlined_call_operand.vmem [shape: f32[1,128], index: 5, kind: input, shape index: {}]   ;;  %s408_s6 = inlined_call_operand.hbm [shape: f32[8,128], index: 6, kind: output, shape index: {}]  }
   0x1   :  { %v25_v0 = vld [vmem:[%s403_s1] sm:$0xff]  ;;  %v35_v1 = vld [vmem:[%s404_s2 + $0x18] sm:$0xff]  ;;  %v34_v2 = vld [vmem:[%s404_s2 + $0x10] sm:$0xff] }
   0x2   :  { %27 = vrot.lane.b32.xlu0 %v25_v0, %s268_s25  ;;  %212 = vmatpush.xpose.msk.msra.mxu0 %vm40_vm0, %v35_v1 }
   0x3   :  { %11 = vsyncpa [#allocation3], 0  ;;  %v33_v3 = vld [vmem:[%s404_s2 + $0x8] sm:$0xff]  ;;  %v32_v4 = vld [vmem:[%s404_s2] sm:$0xff]  ;;  %vm30_vm1 = vcmask 130048   ;;  %v168_v28 = vlaneseq  ;;  %s203_s18 = sshll.u32 %s408_s6, 4  ;;  %s204_s18 = int_to_ptr.hbm [resolvable:$true] %s203_s18 }
   0x4   :  { %v92_v5 = vld [vmem:[%s406_s4 + $0x78] sm:$0xff]  ;;  %v91_v6 = vld [vmem:[%s406_s4 + $0x70] sm:$0xff]  ;;  %v90_v7 = vld [vmem:[%s406_s4 + $0x68] sm:$0xff] }
   0x5   :  { %217 = vmatpush.xpose.msk.msra.mxu1 %vm40_vm0, %v92_v5  ;;  %v89_v8 = vld [vmem:[%s406_s4 + $0x60] sm:$0xff]  ;;  %v88_v9 = vld [vmem:[%s406_s4 + $0x58] sm:$0xff]  ;;  %v87_v10 = vld [vmem:[%s406_s4 + $0x50] sm:$0xff]  ;;  %v169_v29 = vand.u32 127, %v168_v28 }
   0x6   :  { %213 = vmatpush.xpose.msk.msra.mxu0 %vm40_vm0, %v34_v2  ;;  %v86_v11 = vld [vmem:[%s406_s4 + $0x48] sm:$0xff]  ;;  %v85_v12 = vld [vmem:[%s406_s4 + $0x40] sm:$0xff]  ;;  %v84_v15 = vld [vmem:[%s406_s4 + $0x38] sm:$0xff] }
   0x7   :  { %v24_v13 = vld [vmem:[%s402_s0] sm:$0xff]  ;;  %v83_v17 = vld [vmem:[%s406_s4 + $0x30] sm:$0xff]  ;;  %v82_v18 = vld [vmem:[%s406_s4 + $0x28] sm:$0xff]  ;;  %vm170_vm2 = vcmp.lt.s32.totalorder %v169_v29, 8 }
   0x8   :  { %v81_v19 = vld [vmem:[%s406_s4 + $0x20] sm:$0xff]  ;;  %v80_v20 = vld [vmem:[%s406_s4 + $0x18] sm:$0xff]  ;;  %v79_v21 = vld [vmem:[%s406_s4 + $0x10] sm:$0xff] }
   0x9   :  { %218 = vmatpush.xpose.msk.msra.mxu1 %vm40_vm0, %v91_v6  ;;  %v78_v22 = vld [vmem:[%s406_s4 + $0x8] sm:$0xff]  ;;  %v77_v23 = vld [vmem:[%s406_s4] sm:$0xff] }
   0xa   :  { %214 = vmatpush.xpose.msk.msra.mxu0 %vm40_vm0, %v33_v3  ;;  %v236_v24 = vld [vmem:[%s405_s3] ss:$0 sm:$0xff]  ;;  %s269_s3 = smov [#allocation2]  }
   0xb   :  { %v237_v30 = vld [vmem:[%s407_s5] ss:$0 sm:$0xff]  ;;  %s201_s4 = sshll.u32 %s269_s3, 4  ;;  %s202_s4 = int_to_ptr.vmem [resolvable:$true] %s201_s4 }
   0xd   :  { %219 = vmatpush.xpose.msk.msra.mxu1 %vm40_vm0, %v90_v7 }
   0xe   :  { %215 = vmatpush.xpose.msk.msra.mxu0 %vm40_vm0, %v32_v4 }
  0x11   :  { %220 = vmatpush.xpose.msk.msra.mxu1 %vm40_vm0, %v89_v8 }
  0x15   :  { %221 = vmatpush.xpose.msk.msra.mxu1 %vm40_vm0, %v88_v9 }
  0x19   :  { %222 = vmatpush.xpose.msk.msra.mxu1 %vm40_vm0, %v87_v10 }
  0x1d   :  { %223 = vmatpush.xpose.msk.msra.mxu1 %vm40_vm0, %v86_v11 }
  0x21   :  { %224 = vmatpush.xpose.msk.msra.mxu1 %vm40_vm0, %v85_v12 }
  0x25   :  { %225 = vmatpush.xpose.msk.msra.mxu1 %vm40_vm0, %v84_v15 }
  0x29   :  { %226 = vmatpush.xpose.msk.msra.mxu1 %vm40_vm0, %v83_v17 }
  0x2d   :  { %227 = vmatpush.xpose.msk.msra.mxu1 %vm40_vm0, %v82_v18 }
  0x31   :  { %228 = vmatpush.xpose.msk.msra.mxu1 %vm40_vm0, %v81_v19 }
  0x35   :  { %229 = vmatpush.xpose.msk.msra.mxu1 %vm40_vm0, %v80_v20 }
  0x39   :  { %230 = vmatpush.xpose.msk.msra.mxu1 %vm40_vm0, %v79_v21 }
  0x3d   :  { %231 = vmatpush.xpose.msk.msra.mxu1 %vm40_vm0, %v78_v22 }
  0x41   :  { %232 = vmatpush.xpose.msk.msra.mxu1 %vm40_vm0, %v77_v23 }
  0x74   :  { %v28_v14 = vpop.permute.xlu0 %27 }
  0x75   :  { %v31_v16 = vsel %vm30_vm1, %v24_v13, %v28_v14 }
  0x76   :  { %216 = vmatmul.msk.f32.vlgmr.msra.gmra.mxu0 %vm40_vm0, %v31_v16 }
  0xf3   :  { %v73_v25 = vpop.f32.mrf.mxu0 }
  0xf4   :  { %v74_v26 = vadd.f32 %v236_v24, %v73_v25 }
  0xf6   :  { %v76_v27 = vmax.f32 %v74_v26, 0.0 }
  0xf8   :  { %233 = vmatmul.msk.f32.vlgmr.msra.gmra.mxu1 %vm40_vm0, %v76_v27 }
 0x175   :  { %v165_v31 = vpop.f32.mrf.mxu1 }
 0x176   :  { %v166_v32 = vadd.f32 %v237_v30, %v165_v31 }
 0x178   :  { %v171_v33 = vsel %vm170_vm2, %v166_v32, -3.4028235e+38 }
 0x179   :  { %172 = vmax.xlane.f32.xlu0 %v171_v33 }
 0x1ec   :  { %v173_v34 = vpop.xlane.xlu0 %172 }
 0x1ed   :  { %v174_v35 = vsub.f32 %v166_v32, %v173_v34 }
 0x1ef   :  { %v175_v36 = vmul.f32 1.442695, %v174_v35 }
 0x1f1   :  { %238 = vpow2.f32 %v175_v36 }
 0x1f7   :  { %v239_v37 = vpop.eup %238 }
 0x1f8   :  { %v177_v38 = vsel %vm170_vm2, %v239_v37, 0.0 }
 0x1f9   :  { %178 = vadd.xlane.f32.xlu1 %v177_v38 }
 0x26c   :  { %v179_v39 = vpop.xlane.xlu1 %178 }
 0x26d   :  { %240 = vrcp.f32 %v179_v39  ;;  %v191_v43 = vand.u32 2147483648, %v179_v39  ;;  %v189_v45 = vand.u32 2147483647, %v179_v39  ;;  %vm185_vm4 = vweird.f32 %v179_v39 }
 0x26f   :  { %v192_v47 = vor.u32 1.1754944e-38, %v191_v43  ;;  %vm190_vm6 = vcmp.eq.f32.partialorder %v189_v45, 8.507059e+37 }
 0x273   :  { %v241_v40 = vpop.eup %240 }
 0x274   :  { %v181_v41 = vmul.f32 %v241_v40, %v179_v39  ;;  %vm186_vm3 = vweird.f32 %v241_v40 }
 0x275   :  { %vm187_vm5 = vmor %vm185_vm4, %vm186_vm3 }
 0x276   :  { %v182_v42 = vsub.f32 1.0, %v181_v41 }
 0x278   :  { %v183_v44 = vmul.f32 %v241_v40, %v182_v42 }
 0x27a   :  { %v184_v46 = vadd.f32 %v241_v40, %v183_v44 }
 0x27c   :  { %v188_v48 = vsel %vm187_vm5, %v241_v40, %v184_v46 }
 0x27d   :  { %v193_v49 = vsel %vm190_vm6, %v192_v47, %v188_v48 }
 0x27e   :  { %v194_v50 = vmul.f32 %v193_v49, %v177_v38 }
 0x280   :  { %195 = vst [vmem:[#allocation2] sm:$0xff] %v194_v50 }
 0x281   :  { %206 = dma.vmem_to_hbm [thread:$0]  %s202_s4, 128, %s204_s18, [#allocation3]  }
 0x282   :  { %266 = dma.done.wait [#allocation3], 128  }
 0x283   :  { %267 = vsyncadd [#allocation3], 4294967168 }
 0x284   :  { %211 = vsyncpa [#allocation3], 1 }

// kernel: tpu_custom_call.1
= control target key start
LH: loop header
LB: loop body
LE: loop exit
PB: predicated region body
PF: predicated region fallthrough
CT: control target
= control target key end

     0   :  { %vm40_vm0 = vcmask 261120   ;;  %s268_s25 = smov 16   ;;  %s402_s0 = inlined_call_operand.vmem [shape: f32[8,16], index: 0, kind: input, shape index: {}]   ;;  %s403_s1 = inlined_call_operand.vmem [shape: f32[8,16], index: 1, kind: input, shape index: {}]   ;;  %s404_s2 = inlined_call_operand.vmem [shape: f32[32,32], index: 2, kind: input, shape index: {}]   ;;  %s405_s3 = inlined_call_operand.vmem [shape: f32[1,32], index: 3, kind: input, shape index: {}]   ;;  %s406_s4 = inlined_call_operand.vmem [shape: f32[128,32], index: 4, kind: input, shape index: {}]   ;;  %s407_s5 = inlined_call_operand.vmem [shape: f32[1,128], index: 5, kind: input, shape index: {}]   ;;  %s408_s6 = inlined_call_operand.hbm [shape: f32[8,128], index: 6, kind: output, shape index: {}]  }
   0x1   :  { %v25_v0 = vld [vmem:[%s403_s1] sm:$0xff]  ;;  %v35_v1 = vld [vmem:[%s404_s2 + $0x18] sm:$0xff]  ;;  %v34_v2 = vld [vmem:[%s404_s2 + $0x10] sm:$0xff] }
   0x2   :  { %27 = vrot.lane.b32.xlu0 %v25_v0, %s268_s25  ;;  %212 = vmatpush.xpose.msk.msra.mxu0 %vm40_vm0, %v35_v1 }
   0x3   :  { %11 = vsyncpa [#allocation3], 0  ;;  %v33_v3 = vld [vmem:[%s404_s2 + $0x8] sm:$0xff]  ;;  %v32_v4 = vld [vmem:[%s404_s2] sm:$0xff]  ;;  %vm30_vm1 = vcmask 130048   ;;  %v168_v28 = vlaneseq  ;;  %s203_s18 = sshll.u32 %s408_s6, 4  ;;  %s204_s18 = int_to_ptr.hbm [resolvable:$true] %s203_s18 }
   0x4   :  { %v92_v5 = vld [vmem:[%s406_s4 + $0x78] sm:$0xff]  ;;  %v91_v6 = vld [vmem:[%s406_s4 + $0x70] sm:$0xff]  ;;  %v90_v7 = vld [vmem:[%s406_s4 + $0x68] sm:$0xff] }
   0x5   :  { %217 = vmatpush.xpose.msk.msra.mxu1 %vm40_vm0, %v92_v5  ;;  %v89_v8 = vld [vmem:[%s406_s4 + $0x60] sm:$0xff]  ;;  %v88_v9 = vld [vmem:[%s406_s4 + $0x58] sm:$0xff]  ;;  %v87_v10 = vld [vmem:[%s406_s4 + $0x50] sm:$0xff]  ;;  %v169_v29 = vand.u32 127, %v168_v28 }
   0x6   :  { %213 = vmatpush.xpose.msk.msra.mxu0 %vm40_vm0, %v34_v2  ;;  %v86_v11 = vld [vmem:[%s406_s4 + $0x48] sm:$0xff]  ;;  %v85_v12 = vld [vmem:[%s406_s4 + $0x40] sm:$0xff]  ;;  %v84_v15 = vld [vmem:[%s406_s4 + $0x38] sm:$0xff] }
   0x7   :  { %v24_v13 = vld [vmem:[%s402_s0] sm:$0xff]  ;;  %v83_v17 = vld [vmem:[%s406_s4 + $0x30] sm:$0xff]  ;;  %v82_v18 = vld [vmem:[%s406_s4 + $0x28] sm:$0xff]  ;;  %vm170_vm2 = vcmp.lt.s32.totalorder %v169_v29, 8 }
   0x8   :  { %v81_v19 = vld [vmem:[%s406_s4 + $0x20] sm:$0xff]  ;;  %v80_v20 = vld [vmem:[%s406_s4 + $0x18] sm:$0xff]  ;;  %v79_v21 = vld [vmem:[%s406_s4 + $0x10] sm:$0xff] }
   0x9   :  { %218 = vmatpush.xpose.msk.msra.mxu1 %vm40_vm0, %v91_v6  ;;  %v78_v22 = vld [vmem:[%s406_s4 + $0x8] sm:$0xff]  ;;  %v77_v23 = vld [vmem:[%s406_s4] sm:$0xff] }
   0xa   :  { %214 = vmatpush.xpose.msk.msra.mxu0 %vm40_vm0, %v33_v3  ;;  %v236_v24 = vld [vmem:[%s405_s3] ss:$0 sm:$0xff]  ;;  %s269_s3 = smov [#allocation2]  }
   0xb   :  { %v237_v30 = vld [vmem:[%s407_s5] ss:$0 sm:$0xff]  ;;  %s201_s4 = sshll.u32 %s269_s3, 4  ;;  %s202_s4 = int_to_ptr.vmem [resolvable:$true] %s201_s4 }
   0xd   :  { %219 = vmatpush.xpose.msk.msra.mxu1 %vm40_vm0, %v90_v7 }
   0xe   :  { %215 = vmatpush.xpose.msk.msra.mxu0 %vm40_vm0, %v32_v4 }
  0x11   :  { %220 = vmatpush.xpose.msk.msra.mxu1 %vm40_vm0, %v89_v8 }
  0x15   :  { %221 = vmatpush.xpose.msk.msra.mxu1 %vm40_vm0, %v88_v9 }
  0x19   :  { %222 = vmatpush.xpose.msk.msra.mxu1 %vm40_vm0, %v87_v10 }
  0x1d   :  { %223 = vmatpush.xpose.msk.msra.mxu1 %vm40_vm0, %v86_v11 }
  0x21   :  { %224 = vmatpush.xpose.msk.msra.mxu1 %vm40_vm0, %v85_v12 }
  0x25   :  { %225 = vmatpush.xpose.msk.msra.mxu1 %vm40_vm0, %v84_v15 }
  0x29   :  { %226 = vmatpush.xpose.msk.msra.mxu1 %vm40_vm0, %v83_v17 }
  0x2d   :  { %227 = vmatpush.xpose.msk.msra.mxu1 %vm40_vm0, %v82_v18 }
  0x31   :  { %228 = vmatpush.xpose.msk.msra.mxu1 %vm40_vm0, %v81_v19 }
  0x35   :  { %229 = vmatpush.xpose.msk.msra.mxu1 %vm40_vm0, %v80_v20 }
  0x39   :  { %230 = vmatpush.xpose.msk.msra.mxu1 %vm40_vm0, %v79_v21 }
  0x3d   :  { %231 = vmatpush.xpose.msk.msra.mxu1 %vm40_vm0, %v78_v22 }
  0x41   :  { %232 = vmatpush.xpose.msk.msra.mxu1 %vm40_vm0, %v77_v23 }
  0x74   :  { %v28_v14 = vpop.permute.xlu0 %27 }
  0x75   :  { %v31_v16 = vsel %vm30_vm1, %v24_v13, %v28_v14 }
  0x76   :  { %216 = vmatmul.msk.f32.vlgmr.msra.gmra.mxu0 %vm40_vm0, %v31_v16 }
  0xf3   :  { %v73_v25 = vpop.f32.mrf.mxu0 }
  0xf4   :  { %v74_v26 = vadd.f32 %v236_v24, %v73_v25 }
  0xf6   :  { %v76_v27 = vmax.f32 %v74_v26, 0.0 }
  0xf8   :  { %233 = vmatmul.msk.f32.vlgmr.msra.gmra.mxu1 %vm40_vm0, %v76_v27 }
 0x175   :  { %v165_v31 = vpop.f32.mrf.mxu1 }
 0x176   :  { %v166_v32 = vadd.f32 %v237_v30, %v165_v31 }
 0x178   :  { %v171_v33 = vsel %vm170_vm2, %v166_v32, -3.4028235e+38 }
 0x179   :  { %172 = vmax.xlane.f32.xlu0 %v171_v33 }
 0x1ec   :  { %v173_v34 = vpop.xlane.xlu0 %172 }
 0x1ed   :  { %v174_v35 = vsub.f32 %v166_v32, %v173_v34 }
 0x1ef   :  { %v175_v36 = vmul.f32 1.442695, %v174_v35 }
 0x1f1   :  { %238 = vpow2.f32 %v175_v36 }
 0x1f7   :  { %v239_v37 = vpop.eup %238 }
 0x1f8   :  { %v177_v38 = vsel %vm170_vm2, %v239_v37, 0.0 }
 0x1f9   :  { %178 = vadd.xlane.f32.xlu1 %v177_v38 }
 0x26c   :  { %v179_v39 = vpop.xlane.xlu1 %178 }
 0x26d   :  { %240 = vrcp.f32 %v179_v39  ;;  %v191_v43 = vand.u32 2147483648, %v179_v39  ;;  %v189_v45 = vand.u32 2147483647, %v179_v39  ;;  %vm185_vm4 = vweird.f32 %v179_v39 }
 0x26f   :  { %v192_v47 = vor.u32 1.1754944e-38, %v191_v43  ;;  %vm190_vm6 = vcmp.eq.f32.partialorder %v189_v45, 8.507059e+37 }
 0x273   :  { %v241_v40 = vpop.eup %240 }
 0x274   :  { %v181_v41 = vmul.f32 %v241_v40, %v179_v39  ;;  %vm186_vm3 = vweird.f32 %v241_v40 }
 0x275   :  { %vm187_vm5 = vmor %vm185_vm4, %vm186_vm3 }
 0x276   :  { %v182_v42 = vsub.f32 1.0, %v181_v41 }
 0x278   :  { %v183_v44 = vmul.f32 %v241_v40, %v182_v42 }
 0x27a   :  { %v184_v46 = vadd.f32 %v241_v40, %v183_v44 }
 0x27c   :  { %v188_v48 = vsel %vm187_vm5, %v241_v40, %v184_v46 }
 0x27d   :  { %v193_v49 = vsel %vm190_vm6, %v192_v47, %v188_v48 }
 0x27e   :  { %v194_v50 = vmul.f32 %v193_v49, %v177_v38 }
 0x280   :  { %195 = vst [vmem:[#allocation2] sm:$0xff] %v194_v50 }
 0x281   :  { %206 = dma.vmem_to_hbm [thread:$0]  %s202_s4, 128, %s204_s18, [#allocation3]  }
 0x282   :  { %266 = dma.done.wait [#allocation3], 128  }
 0x283   :  { %267 = vsyncadd [#allocation3], 4294967168 }
 0x284   :  { %211 = vsyncpa [#allocation3], 1 }

</bundles_post_ra>
